<compile_context>
chip_gen: v6e
topology: v6e:2x2x1
jax: 0.10.0
libtpu: 0.0.40
codegen_flags: <defaults>
</compile_context>

<pallas_src>
import functools

import jax
import jax.numpy as jnp
from jax import lax
from jax.experimental import pallas as pl
from jax.experimental.pallas import tpu as pltpu


def _conv3x3_shuffle_relu_kernel(x_ref, w_ref, b_ref, o_ref, lhs_ref):
    """One batch element: 3x3 conv (pad=1) + bias + ReLU as a single MXU matmul.

    x_ref  : (1, H, W*Cin)       input packed so (w, ci) sits on the lane axis
    w_ref  : (3*W*Cin, W*Ctot)   banded im2col weight (horizontal taps + pad + the
                                 PixelShuffle column permutation folded in)
    b_ref  : (1, W*Ctot)         bias, permuted/tiled to match w_ref columns
    o_ref  : (1, H, W*Ctot)      lane-dense packed conv+bias+relu output,
                                 lane order = (i, w_out, j, c_out)
    lhs_ref: (H, 3*W*Cin)        VMEM scratch: [rows h-1 | rows h | rows h+1]
    """
    H = o_ref.shape[1]
    WC = x_ref.shape[2]
    x = x_ref[0]                                    # (H, W*Cin)
    zrow = jnp.zeros((1, WC), x.dtype)

    # ky = 0 tap (input row h-1); row 0 is the vertical zero pad.
    lhs_ref[0:1, 0:WC] = zrow
    lhs_ref[1:H, 0:WC] = x[0:H - 1, :]
    # ky = 1 tap (input row h).
    lhs_ref[:, WC:2 * WC] = x
    # ky = 2 tap (input row h+1); last row is the vertical zero pad.
    lhs_ref[0:H - 1, 2 * WC:3 * WC] = x[1:H, :]
    lhs_ref[H - 1:H, 2 * WC:3 * WC] = zrow

    # Single MXU matmul: (H, 3*W*Cin) x (3*W*Cin, W*Ctot) -> (H, W*Ctot).
    acc = jnp.dot(lhs_ref[...], w_ref[...], preferred_element_type=jnp.float32)
    acc = acc + b_ref[...]                          # (1, W*Ctot) broadcasts over rows
    o_ref[0] = jnp.maximum(acc, 0.0).astype(o_ref.dtype)


def _conv_shuffle_relu_packed(x_packed, w_banded, b_packed):
    """x_packed: (N, H, W*Cin); w_banded: (3*W*Cin, W*Ctot); b_packed: (1, W*Ctot)."""
    N, H, WC = x_packed.shape
    K, WCtot = w_banded.shape
    return pl.pallas_call(
        _conv3x3_shuffle_relu_kernel,
        out_shape=jax.ShapeDtypeStruct((N, H, WCtot), x_packed.dtype),
        grid_spec=pltpu.PrefetchScalarGridSpec(
            num_scalar_prefetch=0,
            grid=(N,),
            in_specs=[
                pl.BlockSpec((1, H, WC), lambda n: (n, 0, 0)),
                pl.BlockSpec((K, WCtot), lambda n: (0, 0)),   # constant -> stays resident
                pl.BlockSpec((1, WCtot), lambda n: (0, 0)),
            ],
            out_specs=pl.BlockSpec((1, H, WCtot), lambda n: (n, 0, 0)),
            scratch_shapes=[pltpu.VMEM((H, K), x_packed.dtype)],
        ),
        compiler_params=pltpu.CompilerParams(
            dimension_semantics=("parallel",)),
    )(x_packed, w_banded, b_packed)


def pixel_shuffle_module(x_nchw, weight_oihw, bias, upscale_factor):
    """Full forward of the PyTorch PixelShuffle module.

    x_nchw: (N, Cin, H, W); weight_oihw: (Cout*r^2, Cin, 3, 3); bias: (Cout*r^2,)
    returns (N, Cout, H*r, W*r)  (NCHW, matching torch).
    """
    r = upscale_factor
    N, Cin, H, W = x_nchw.shape
    Ctot = weight_oihw.shape[0]          # output_dim * r^2
    Cout = Ctot // (r * r)

    # --- glue: pack input so (w, ci) sits on the lane axis ------------------
    x_packed = jnp.transpose(x_nchw, (0, 2, 3, 1)).reshape(N, H, W * Cin)

    # --- glue: banded im2col weight ------------------------------------------
    # R[(ky, wi, ci), (wo, ct)] = weight[ct, ci, ky, wi - wo + 1] if 0 <= wi-wo+1 < 3 else 0
    w_hwio = jnp.transpose(weight_oihw, (2, 3, 1, 0))          # (3, 3, Cin, Ctot)
    wi = jnp.arange(W)[:, None, None]
    wo = jnp.arange(W)[None, :, None]
    kx = jnp.arange(3)[None, None, :]
    band = (wi == wo + kx - 1).astype(w_hwio.dtype)            # (W, W, 3)
    w_banded = jnp.einsum("abk,ykcf->yacbf", band, w_hwio)     # (ky, wi, ci, wo, ct)

    # Fold the PixelShuffle permutation into the rhs columns:
    #   ct = c*r*r + i*r + j ;  new column order = (i, wo, j, c)
    # so kernel output row h is already out[n, h*r+i, wo*r+j, c] in NHWC order.
    w_banded = w_banded.reshape(3, W, Cin, W, Cout, r, r)      # (ky, wi, ci, wo, c, i, j)
    w_banded = jnp.transpose(w_banded, (0, 1, 2, 5, 3, 6, 4))  # (ky, wi, ci, i, wo, j, c)
    w_banded = w_banded.reshape(3 * W * Cin, r * W * r * Cout)

    b_perm = jnp.transpose(bias.reshape(Cout, r, r), (1, 2, 0))        # (i, j, c)
    b_packed = jnp.broadcast_to(b_perm[:, None, :, :],
                                (r, W, r, Cout)).reshape(1, W * Ctot)  # (i, wo, j, c)

    # --- Pallas kernel: conv3x3 + bias + ReLU, lane-dense packed output -----
    y = _conv_shuffle_relu_packed(x_packed, w_banded, b_packed)  # (N, H, W*Ctot)

    # --- glue: lane order is already shuffled -> pure reshape + NCHW transpose
    y = y.reshape(N, H * r, W * r, Cout)
    return jnp.transpose(y, (0, 3, 1, 2))


def _reference(x_nchw, weight_oihw, bias, r):
    """Pure-JAX reference mirroring the PyTorch module."""
    y = lax.conv_general_dilated(
        x_nchw, weight_oihw, window_strides=(1, 1), padding=((1, 1), (1, 1)),
        dimension_numbers=("NCHW", "OIHW", "NCHW"))
    y = y + bias[None, :, None, None]
    N, Ctot, H, W = y.shape
    C = Ctot // (r * r)
    y = y.reshape(N, C, r, r, H, W).transpose(0, 1, 4, 2, 5, 3).reshape(N, C, H * r, W * r)
    return jnp.maximum(y, 0.0)


if __name__ == "__main__":
    # Module hyper-params (small, consistent with the forward pass).
    input_dim, output_dim, upscale_factor = 4, 4, 2
    N, H, W = 2, 16, 16
    Ctot = output_dim * upscale_factor ** 2   # conv output channels = 16

    key = jax.random.PRNGKey(0)
    kx_, kw_, kb_ = jax.random.split(key, 3)

    x = jax.random.normal(kx_, (N, input_dim, H, W), dtype=jnp.float32)
    # Deterministic parameter init (shapes from nn.Conv2d(input_dim, Ctot, 3, 1, 1)).
    fan_in = input_dim * 3 * 3
    bound = 1.0 / (fan_in ** 0.5)
    weight = jax.random.uniform(kw_, (Ctot, input_dim, 3, 3),
                                minval=-bound, maxval=bound, dtype=jnp.float32)
    bias = jax.random.uniform(kb_, (Ctot,), minval=-bound, maxval=bound,
                              dtype=jnp.float32)

    fwd = jax.jit(functools.partial(pixel_shuffle_module,
                                    upscale_factor=upscale_factor))
    out = fwd(x, weight, bias)
    out = jax.block_until_ready(out)

    assert out.shape == (N, output_dim, H * upscale_factor, W * upscale_factor), out.shape

    ref = _reference(x, weight, bias, upscale_factor)
    assert jnp.allclose(out, ref, rtol=1e-3, atol=1e-3), \
        float(jnp.max(jnp.abs(out - ref)))

    print("KERNEL_OK")
</pallas_src>

<mosaic_0001>
module attributes {stable_mosaic.version = 11 : i64} {
  func.func @_conv3x3_shuffle_relu_kernel(%arg0: i32, %arg1: memref<1x16x64xf32, #tpu.memory_space<vmem>>, %arg2: memref<192x256xf32, #tpu.memory_space<vmem>>, %arg3: memref<1x256xf32, #tpu.memory_space<vmem>>, %arg4: memref<1x16x256xf32, #tpu.memory_space<vmem>>, %arg5: memref<16x192xf32, #tpu.memory_space<vmem>>) attributes {dimension_semantics = [#tpu.dimension_semantics<parallel>], iteration_bounds = array<i64: 2>, scalar_prefetch = 0 : i64, scratch_operands = 1 : i64, tpu.core_type = #tpu.core_type<tc>, window_params = [{transform_indices = @transform_0, window_bounds = array<i64: 1, 16, 64>}, {pipeline_mode = #tpu.pipeline_mode<synchronous>, transform_indices = @transform_1, window_bounds = array<i64: 192, 256>}, {pipeline_mode = #tpu.pipeline_mode<synchronous>, transform_indices = @transform_2, window_bounds = array<i64: 1, 256>}, {transform_indices = @transform_3, window_bounds = array<i64: 1, 16, 256>}]} {
    %c0 = arith.constant 0 : index
    %c0_0 = arith.constant 0 : index
    %c0_1 = arith.constant 0 : index
    %0 = vector.load %arg1[%c0, %c0_0, %c0_1] : memref<1x16x64xf32, #tpu.memory_space<vmem>>, vector<1x16x64xf32>
    %1 = vector.shape_cast %0 : vector<1x16x64xf32> to vector<16x64xf32>
    %cst = arith.constant 0.000000e+00 : f32
    %2 = vector.broadcast %cst : f32 to vector<1x64xf32>
    %c0_2 = arith.constant 0 : index
    %c0_3 = arith.constant 0 : index
    %3 = vector.load %arg5[%c0_2, %c0_3] : memref<16x192xf32, #tpu.memory_space<vmem>>, vector<1x64xf32>
    tpu.vector_store %arg5[%c0_2, %c0_3], %2 {strides = array<i32>} : memref<16x192xf32, #tpu.memory_space<vmem>>, vector<1x64xf32>,
    %4 = vector.extract_strided_slice %1 {offsets = [0, 0], sizes = [15, 64], strides = [1, 1]} : vector<16x64xf32> to vector<15x64xf32>
    %c1 = arith.constant 1 : index
    %c0_4 = arith.constant 0 : index
    %5 = vector.load %arg5[%c1, %c0_4] : memref<16x192xf32, #tpu.memory_space<vmem>>, vector<15x64xf32>
    tpu.vector_store %arg5[%c1, %c0_4], %4 {strides = array<i32>} : memref<16x192xf32, #tpu.memory_space<vmem>>, vector<15x64xf32>,
    %c0_5 = arith.constant 0 : index
    %c64 = arith.constant 64 : index
    %6 = vector.load %arg5[%c0_5, %c64] : memref<16x192xf32, #tpu.memory_space<vmem>>, vector<16x64xf32>
    tpu.vector_store %arg5[%c0_5, %c64], %1 {strides = array<i32>} : memref<16x192xf32, #tpu.memory_space<vmem>>, vector<16x64xf32>,
    %7 = vector.extract_strided_slice %1 {offsets = [1, 0], sizes = [15, 64], strides = [1, 1]} : vector<16x64xf32> to vector<15x64xf32>
    %c0_6 = arith.constant 0 : index
    %c128 = arith.constant 128 : index
    %8 = vector.load %arg5[%c0_6, %c128] : memref<16x192xf32, #tpu.memory_space<vmem>>, vector<15x64xf32>
    tpu.vector_store %arg5[%c0_6, %c128], %7 {strides = array<i32>} : memref<16x192xf32, #tpu.memory_space<vmem>>, vector<15x64xf32>,
    %c15 = arith.constant 15 : index
    %c128_7 = arith.constant 128 : index
    %9 = vector.load %arg5[%c15, %c128_7] : memref<16x192xf32, #tpu.memory_space<vmem>>, vector<1x64xf32>
    tpu.vector_store %arg5[%c15, %c128_7], %2 {strides = array<i32>} : memref<16x192xf32, #tpu.memory_space<vmem>>, vector<1x64xf32>,
    %c0_8 = arith.constant 0 : index
    %c0_9 = arith.constant 0 : index
    %10 = vector.load %arg5[%c0_8, %c0_9] : memref<16x192xf32, #tpu.memory_space<vmem>>, vector<16x192xf32>
    %c0_10 = arith.constant 0 : index
    %c0_11 = arith.constant 0 : index
    %11 = vector.load %arg2[%c0_10, %c0_11] : memref<192x256xf32, #tpu.memory_space<vmem>>, vector<192x256xf32>
    %cst_12 = arith.constant dense<0.000000e+00> : vector<16x256xf32>
    %12 = tpu.matmul %10, %11, %cst_12 {dimension_numbers = #tpu.dot_dimension_numbers<[1], [0], [0], [1], [0, 0, 1, 1], [], []>} : vector<16x192xf32>, vector<192x256xf32>, vector<16x256xf32> -> vector<16x256xf32>
    %c0_13 = arith.constant 0 : index
    %c0_14 = arith.constant 0 : index
    %13 = vector.load %arg3[%c0_13, %c0_14] : memref<1x256xf32, #tpu.memory_space<vmem>>, vector<1x256xf32>
    %14 = vector.broadcast %13 : vector<1x256xf32> to vector<16x256xf32>
    %15 = arith.addf %12, %14 : vector<16x256xf32>
    %cst_15 = arith.constant 0.000000e+00 : f32
    %16 = vector.broadcast %cst_15 : f32 to vector<16x256xf32>
    %17 = arith.maximumf %15, %16 : vector<16x256xf32>
    %c0_16 = arith.constant 0 : index
    %c0_17 = arith.constant 0 : index
    %c0_18 = arith.constant 0 : index
    %18 = vector.load %arg4[%c0_16, %c0_17, %c0_18] : memref<1x16x256xf32, #tpu.memory_space<vmem>>, vector<1x16x256xf32>
    %19 = vector.shape_cast %18 : vector<1x16x256xf32> to vector<16x256xf32>
    %20 = vector.shape_cast %17 : vector<16x256xf32> to vector<1x16x256xf32>
    tpu.vector_store %arg4[%c0_16, %c0_17, %c0_18], %20 {strides = array<i32>} : memref<1x16x256xf32, #tpu.memory_space<vmem>>, vector<1x16x256xf32>,
    return
  }
  func.func @transform_0(%arg0: i32) -> (i32, i32, i32) {
    %c0_i32 = arith.constant 0 : i32
    %c0_i32_0 = arith.constant 0 : i32
    %c0_i32_1 = arith.constant 0 : i32
    return %arg0, %c0_i32, %c0_i32_0 : i32, i32, i32
  }
  func.func @transform_1(%arg0: i32) -> (i32, i32) {
    %c0_i32 = arith.constant 0 : i32
    %c0_i32_0 = arith.constant 0 : i32
    %c0_i32_1 = arith.constant 0 : i32
    return %c0_i32, %c0_i32_0 : i32, i32
  }
  func.func @transform_2(%arg0: i32) -> (i32, i32) {
    %c0_i32 = arith.constant 0 : i32
    %c0_i32_0 = arith.constant 0 : i32
    %c0_i32_1 = arith.constant 0 : i32
    return %c0_i32, %c0_i32_0 : i32, i32
  }
  func.func @transform_3(%arg0: i32) -> (i32, i32, i32) {
    %c0_i32 = arith.constant 0 : i32
    %c0_i32_0 = arith.constant 0 : i32
    %c0_i32_1 = arith.constant 0 : i32
    return %arg0, %c0_i32, %c0_i32_0 : i32, i32, i32
  }
}

</mosaic_0001>

<bundles_post_ra>
// kernel: pixel_shuffle_module.1
= control target key start
LH: loop header
LB: loop body
LE: loop exit
PB: predicated region body
PF: predicated region fallthrough
CT: control target
= control target key end

     0   :  { %s519_s12 = smov 0   ;;  %s695_s0 = inlined_call_operand.vmem [shape: f32[2,16,64], index: 0, kind: input, shape index: {}]   ;;  %s696_s1 = inlined_call_operand.vmem [shape: f32[192,256], index: 1, kind: input, shape index: {}]   ;;  %s697_s2 = inlined_call_operand.vmem [shape: f32[1,256], index: 2, kind: input, shape index: {}]   ;;  %s698_s3 = inlined_call_operand.vmem [shape: f32[2,16,256], index: 3, kind: output, shape index: {}]  }
   0x1 LB: > { %s416_s13 = sadd.s32 4294967295, %s495_s12   ;;  %p420_p0 = scmp.ge.s32.totalorder %s495_s12, 1  ;;  %s495_s12 = sphi %s519_s12, %s13_s12  }
   0x2   : > { %p137_p1 = scmp.lt.s32.totalorder %s495_s12, 3 }
   0x4   : > { %p138_p2 = pnand %p420_p0, %p137_p1 }
   0x5   : > { %p161_p3 = scmp.lt.s32.totalorder (!%p138_p2), %s416_s13, 1  ;;  %s498_s9 = smov (!%p138_p2), 64  }
   0x6   : > { %141 = sbr.rel (%p138_p2) target bundleno = 345 (0x159), region = 32 }
   0xb   : > { %v241_v0 = vld [vmem:[%s696_s1 + $0xf8] sm:$0xff]  ;;  %v240_v1 = vld [vmem:[%s696_s1 + $0xf0] sm:$0xff]  ;;  %v239_v2 = vld [vmem:[%s696_s1 + $0xe8] sm:$0xff]  ;;  %vm173_vm0 = vcmask 516096   ;;  %s700_s13 = smov (!%p161_p3, %s416_s13), 1  ;;  %v497_v5 = vmov 0.0   ;;  %v260_v63 = vlaneseq }
   0xc   : > { %276 = vmatprep.subr.mxu0 %v241_v0  ;;  %v238_v3 = vld [vmem:[%s696_s1 + $0xe0] sm:$0xff]  ;;  %431 = vmatprep.subr.mxu1 %v241_v0  ;;  %v237_v4 = vld [vmem:[%s696_s1 + $0xd8] sm:$0xff]  ;;  %174 = vst.msk [vmem:[#allocation2] sm:$0x1] %vm173_vm0, %v497_v5  ;;  %205 = vst.msk [vmem:[#allocation2 + $0x1f] sm:$0x1] %vm173_vm0, %v497_v5 }
   0xd   : > { %277 = vmatpush1.msra.mxu0 %v240_v1  ;;  %455 = vmatpush1.msra.mxu1 %v240_v1  ;;  %v236_v6 = vld [vmem:[%s696_s1 + $0xd0] sm:$0xff]  ;;  %s429_s26 = sshll.u32 %s700_s13, 4  ;;  %v235_v7 = vld [vmem:[%s696_s1 + $0xc8] sm:$0xff]  ;;  %vm183_vm1 = vcmask 523265   ;;  %vm196_vm2 = vcmask 1046528   ;;  %v234_v8 = vld [vmem:[%s696_s1 + $0xc0] sm:$0xff] }
   0xe   : > { %278 = vmatprep.subr.mxu0 %v239_v2  ;;  %432 = vmatprep.subr.mxu1 %v239_v2  ;;  %s165_s4 = scalar_lea.vmem %s695_s0, %s429_s26  ;;  %vm203_vm3 = vcmask 522240   ;;  %v233_v11 = vld [vmem:[%s696_s1 + $0xb8] sm:$0xff]  ;;  %vm177_vm4 = vcmask 1040384   ;;  %vm185_vm5 = vcmask 523264   ;;  %v232_v16 = vld [vmem:[%s696_s1 + $0xb0] sm:$0xff]  ;;  %v231_v17 = vld [vmem:[%s696_s1 + $0xa8] sm:$0xff] }
   0xf   : > { %279 = vmatpush1.msra.mxu0 %v238_v3  ;;  %456 = vmatpush1.msra.mxu1 %v238_v3  ;;  %v171_v9 = vld [vmem:[%s165_s4] sm:$0xff]  ;;  %v172_v10 = vld [vmem:[%s165_s4 + $0x8] sm:$0xff]  ;;  %v229_v21 = vld [vmem:[%s696_s1 + $0x98] sm:$0xff]  ;;  %vm193_vm6 = vcmask 1048064   ;;  %v261_v0 = vshrl.u32 %v260_v63, 7  ;;  %s430_s17 = sshll.u32 %s700_s13, 5 }
  0x10   : > { %280 = vmatprep.subr.mxu0 %v237_v4  ;;  %433 = vmatprep.subr.mxu1 %v237_v4  ;;  %v178_v12 = vrot.slane %v171_v9, 7  ;;  %v197_v13 = vrot.slane %v171_v9, 1  ;;  %v179_v14 = vrot.slane %v172_v10, 7  ;;  %v198_v15 = vrot.slane %v172_v10, 1  ;;  %v230_v19 = vld [vmem:[%s696_s1 + $0xa0] sm:$0xff]  ;;  %v228_v22 = vld [vmem:[%s696_s1 + $0x90] sm:$0xff]  ;;  %s170_s20 = scalar_lea.vmem %s698_s3, %s430_s17 }
  0x11   : > { %281 = vmatpush1.msra.mxu0 %v236_v6  ;;  %457 = vmatpush1.msra.mxu1 %v236_v6  ;;  %v227_v23 = vld [vmem:[%s696_s1 + $0x88] sm:$0xff]  ;;  %v226_v24 = vld [vmem:[%s696_s1 + $0x80] sm:$0xff]  ;;  %v225_v25 = vld [vmem:[%s696_s1 + $0x78] sm:$0xff]  ;;  %v262_v1 = vsub.s32 0, %v261_v0  ;;  %v266_v3 = vsub.s32 1, %v261_v0 }
  0x12   : > { %187 = vrot.lane.b32.xlu0 %v171_v9, %s498_s9  ;;  %282 = vmatprep.subr.mxu0 %v235_v7  ;;  %184 = vst.msk [vmem:[#allocation2] sm:$0xfe] %vm183_vm1, %v178_v12  ;;  %v199_v18 = vsel %vm196_vm2, %v197_v13, %v198_v15  ;;  %v180_v20 = vsel %vm177_vm4, %v178_v12, %v179_v14  ;;  %v224_v26 = vld [vmem:[%s696_s1 + $0x70] sm:$0xff]  ;;  %v223_v27 = vld [vmem:[%s696_s1 + $0x68] sm:$0xff]  ;;  %v222_v28 = vld [vmem:[%s696_s1 + $0x60] sm:$0xff] }
  0x13   : > { %283 = vmatpush1.msra.mxu0 %v234_v8  ;;  %434 = vmatprep.subr.mxu1 %v235_v7  ;;  %204 = vst.msk [vmem:[#allocation2 + $0x18] sm:$0x7f] %vm203_vm3, %v198_v15  ;;  %v221_v29 = vld [vmem:[%s696_s1 + $0x58] sm:$0xff]  ;;  %v220_v30 = vld [vmem:[%s696_s1 + $0x50] sm:$0xff]  ;;  %v219_v31 = vld [vmem:[%s696_s1 + $0x48] sm:$0xff] }
  0x14   : > { %284 = vmatprep.subr.mxu0 %v233_v11  ;;  %458 = vmatpush1.msra.mxu1 %v234_v8  ;;  %186 = vst.msk [vmem:[#allocation2 + $0x10] sm:$0xff] %vm185_vm5, %v180_v20  ;;  %202 = vst.msk [vmem:[#allocation2 + $0x8] sm:$0xff] %vm185_vm5, %v199_v18  ;;  %v218_v32 = vld [vmem:[%s696_s1 + $0x40] sm:$0xff]  ;;  %v217_v33 = vld [vmem:[%s696_s1 + $0x38] sm:$0xff] }
  0x15   : > { %285 = vmatpush1.msra.mxu0 %v232_v16  ;;  %435 = vmatprep.subr.mxu1 %v233_v11  ;;  %v216_v34 = vld [vmem:[%s696_s1 + $0x30] sm:$0xff]  ;;  %v215_v35 = vld [vmem:[%s696_s1 + $0x28] sm:$0xff]  ;;  %v214_v36 = vld [vmem:[%s696_s1 + $0x20] sm:$0xff] }
  0x16   : > { %189 = vrot.lane.b32.xlu0 %v172_v10, %s498_s9  ;;  %286 = vmatprep.subr.mxu0 %v231_v17  ;;  %v213_v37 = vld [vmem:[%s696_s1 + $0x18] sm:$0xff]  ;;  %v212_v38 = vld [vmem:[%s696_s1 + $0x10] sm:$0xff]  ;;  %v211_v39 = vld [vmem:[%s696_s1 + $0x8] sm:$0xff] }
  0x17   : > { %287 = vmatpush1.msra.mxu0 %v230_v19  ;;  %459 = vmatpush1.msra.mxu1 %v232_v16  ;;  %v210_v40 = vld [vmem:[%s696_s1] sm:$0xff]  ;;  %v257_v41 = vld [vmem:[%s696_s1 + $0x178] sm:$0xff]  ;;  %v256_v42 = vld [vmem:[%s696_s1 + $0x170] sm:$0xff] }
  0x18   : > { %288 = vmatprep.subr.mxu0 %v229_v21  ;;  %436 = vmatprep.subr.mxu1 %v231_v17  ;;  %v255_v43 = vld [vmem:[%s696_s1 + $0x168] sm:$0xff]  ;;  %v254_v44 = vld [vmem:[%s696_s1 + $0x160] sm:$0xff]  ;;  %v253_v45 = vld [vmem:[%s696_s1 + $0x158] sm:$0xff] }
  0x19   : > { %289 = vmatpush1.msra.mxu0 %v228_v22  ;;  %460 = vmatpush1.msra.mxu1 %v230_v19  ;;  %v252_v46 = vld [vmem:[%s696_s1 + $0x150] sm:$0xff]  ;;  %v251_v47 = vld [vmem:[%s696_s1 + $0x148] sm:$0xff]  ;;  %v250_v48 = vld [vmem:[%s696_s1 + $0x140] sm:$0xff] }
  0x1a   : > { %290 = vmatprep.subr.mxu0 %v227_v23  ;;  %437 = vmatprep.subr.mxu1 %v229_v21  ;;  %v249_v49 = vld [vmem:[%s696_s1 + $0x138] sm:$0xff]  ;;  %v248_v50 = vld [vmem:[%s696_s1 + $0x130] sm:$0xff]  ;;  %v247_v51 = vld [vmem:[%s696_s1 + $0x128] sm:$0xff] }
  0x1b   : > { %291 = vmatpush1.msra.mxu0 %v226_v24  ;;  %461 = vmatpush1.msra.mxu1 %v228_v22  ;;  %v246_v52 = vld [vmem:[%s696_s1 + $0x120] sm:$0xff]  ;;  %v245_v53 = vld [vmem:[%s696_s1 + $0x118] sm:$0xff]  ;;  %v244_v54 = vld [vmem:[%s696_s1 + $0x110] sm:$0xff] }
  0x1c   : > { %292 = vmatprep.subr.mxu0 %v225_v25  ;;  %438 = vmatprep.subr.mxu1 %v227_v23  ;;  %v243_v55 = vld [vmem:[%s696_s1 + $0x108] sm:$0xff]  ;;  %v242_v57 = vld [vmem:[%s696_s1 + $0x100] sm:$0xff]  ;;  %v209_v58 = vld [vmem:[#allocation2 + $0x18] sm:$0xff] }
  0x1d   : > { %293 = vmatpush1.msra.mxu0 %v224_v26  ;;  %462 = vmatpush1.msra.mxu1 %v226_v24  ;;  %v207_v56 = vld [vmem:[#allocation2 + $0x8] sm:$0xff]  ;;  %v258_v2 = vld [vmem:[%s697_s2] sm:$0x3] }
  0x1e   : > { %294 = vmatprep.subr.mxu0 %v223_v27  ;;  %439 = vmatprep.subr.mxu1 %v225_v25  ;;  %v263_v4 = vrot.slane %v258_v2, %v262_v1  ;;  %v267_v5 = vrot.slane %v258_v2, %v266_v3 }
  0x1f   : > { %295 = vmatpush1.msra.mxu0 %v222_v28  ;;  %463 = vmatpush1.msra.mxu1 %v224_v26 }
  0x20   : > { %296 = vmatprep.subr.mxu0 %v221_v29  ;;  %440 = vmatprep.subr.mxu1 %v223_v27 }
  0x21   : > { %297 = vmatpush1.msra.mxu0 %v220_v30  ;;  %464 = vmatpush1.msra.mxu1 %v222_v28 }
  0x22   : > { %298 = vmatprep.subr.mxu0 %v219_v31  ;;  %441 = vmatprep.subr.mxu1 %v221_v29 }
  0x23   : > { %299 = vmatpush1.msra.mxu0 %v218_v32  ;;  %465 = vmatpush1.msra.mxu1 %v220_v30 }
  0x24   : > { %300 = vmatprep.subr.mxu0 %v217_v33  ;;  %442 = vmatprep.subr.mxu1 %v219_v31 }
  0x25   : > { %301 = vmatpush1.msra.mxu0 %v216_v34  ;;  %466 = vmatpush1.msra.mxu1 %v218_v32 }
  0x26   : > { %302 = vmatprep.subr.mxu0 %v215_v35  ;;  %443 = vmatprep.subr.mxu1 %v217_v33 }
  0x27   : > { %303 = vmatpush1.msra.mxu0 %v214_v36  ;;  %467 = vmatpush1.msra.mxu1 %v216_v34 }
  0x28   : > { %304 = vmatprep.subr.mxu0 %v213_v37  ;;  %444 = vmatprep.subr.mxu1 %v215_v35 }
  0x29   : > { %305 = vmatpush1.msra.mxu0 %v212_v38  ;;  %468 = vmatpush1.msra.mxu1 %v214_v36 }
  0x2a   : > { %306 = vmatprep.subr.mxu0 %v211_v39  ;;  %445 = vmatprep.subr.mxu1 %v213_v37 }
  0x2b   : > { %307 = vmatpush1.msra.mxu0 %v210_v40  ;;  %469 = vmatpush1.msra.mxu1 %v212_v38 }
  0x2c   : > { %324 = vmatprep.subr.mxu0 %v257_v41  ;;  %446 = vmatprep.subr.mxu1 %v211_v39 }
  0x2d   : > { %325 = vmatpush2.msra.mxu0 %v256_v42  ;;  %470 = vmatpush1.msra.mxu1 %v210_v40 }
  0x2e   : > { %326 = vmatprep.subr.mxu0 %v255_v43  ;;  %447 = vmatprep.subr.mxu1 %v257_v41 }
  0x2f   : > { %327 = vmatpush2.msra.mxu0 %v254_v44  ;;  %471 = vmatpush2.msra.mxu1 %v256_v42 }
  0x30   : > { %328 = vmatprep.subr.mxu0 %v253_v45  ;;  %448 = vmatprep.subr.mxu1 %v255_v43 }
  0x31   : > { %329 = vmatpush2.msra.mxu0 %v252_v46  ;;  %472 = vmatpush2.msra.mxu1 %v254_v44 }
  0x32   : > { %330 = vmatprep.subr.mxu0 %v251_v47  ;;  %449 = vmatprep.subr.mxu1 %v253_v45 }
  0x33   : > { %331 = vmatpush2.msra.mxu0 %v250_v48  ;;  %473 = vmatpush2.msra.mxu1 %v252_v46 }
  0x34   : > { %332 = vmatprep.subr.mxu0 %v249_v49  ;;  %450 = vmatprep.subr.mxu1 %v251_v47 }
  0x35   : > { %333 = vmatpush2.msra.mxu0 %v248_v50  ;;  %474 = vmatpush2.msra.mxu1 %v250_v48 }
  0x36   : > { %334 = vmatprep.subr.mxu0 %v247_v51  ;;  %451 = vmatprep.subr.mxu1 %v249_v49 }
  0x37   : > { %335 = vmatpush2.msra.mxu0 %v246_v52  ;;  %475 = vmatpush2.msra.mxu1 %v248_v50 }
  0x38   : > { %336 = vmatprep.subr.mxu0 %v245_v53  ;;  %452 = vmatprep.subr.mxu1 %v247_v51 }
  0x39   : > { %337 = vmatpush2.msra.mxu0 %v244_v54  ;;  %476 = vmatpush2.msra.mxu1 %v246_v52 }
  0x3a   : > { %338 = vmatprep.subr.mxu0 %v243_v55  ;;  %425 = vmatprep.mubr.msk.f32.mxu0 %vm185_vm5, %v207_v56 }
  0x3b   : > { %339 = vmatpush2.msra.mxu0 %v242_v57  ;;  %453 = vmatprep.subr.mxu1 %v245_v53 }
  0x3c   : > { %477 = vmatpush2.msra.mxu1 %v244_v54  ;;  %426 = vmatprep.mubr.msk.f32.mxu1 %vm185_vm5, %v209_v58 }
  0x3d   : > { %454 = vmatprep.subr.mxu1 %v243_v55 }
  0x3e   : > { %478 = vmatpush2.msra.mxu1 %v242_v57 }
  0x84   : > { %v188_v59 = vpop.permute.xlu0 %187 }
  0x85   : > { %194 = vst.msk [vmem:[#allocation2] sm:$0xff] %vm193_vm6, %v188_v59 }
  0x88   : > { %v190_v60 = vpop.permute.xlu0 %189 }
  0x89   : > { %195 = vst.msk [vmem:[#allocation2 + $0x10] sm:$0xff] %vm193_vm6, %v190_v60 }
  0x8c   : > { %v206_v61 = vld [vmem:[#allocation2] sm:$0xff] }
  0x8d   : > { %341 = vmatmul.mubr.f32.vlgmr.msra.gmra.mxu0 %v206_v61 }
  0x90   : > { %v208_v62 = vld [vmem:[#allocation2 + $0x10] sm:$0xff] }
  0x91   : > { %347 = vmatmul.mubr.f32.vlgmr.msra.gmra.mxu1 %v208_v62 }
 0x14d   : > { %v342_v6 = vpop.f32.mrf.mxu0 }
 0x14e   : > { %v343_v7 = vadd.f32 %v342_v6, %v263_v4 }
 0x14f   : > { %v344_v8 = vpop.f32.mrf.mxu0 }
 0x150   : > { %v353_v9 = vmax.f32 %v343_v7, 0.0  ;;  %v345_v10 = vadd.f32 %v344_v8, %v267_v5 }
 0x151   : > { %v348_v11 = vpop.f32.mrf.mxu1 }
 0x152   : > { %357 = vst [vmem:[%s170_s20] sm:$0xff] %v353_v9  ;;  %v354_v12 = vmax.f32 %v345_v10, 0.0  ;;  %v349_v13 = vadd.f32 %v348_v11, %v263_v4 }
 0x153   : > { %v350_v14 = vpop.f32.mrf.mxu1 }
 0x154   : > { %358 = vst [vmem:[%s170_s20 + $0x8] sm:$0xff] %v354_v12  ;;  %v355_v15 = vmax.f32 %v349_v13, 0.0  ;;  %v351_v16 = vadd.f32 %v350_v14, %v267_v5 }
 0x156   : > { %359 = vst [vmem:[%s170_s20 + $0x10] sm:$0xff] %v355_v15  ;;  %v356_v17 = vmax.f32 %v351_v16, 0.0 }
 0x158   : > { %360 = vst [vmem:[%s170_s20 + $0x18] sm:$0xff] %v356_v17 }
 0x159 PF: > { %s13_s12 = sadd.s32 1, %s495_s12  }
 0x15a   : > { %p10_p4 = scmp.ge.s32.totalorder %s13_s12, 4  }
 0x15c   :  { %12 = sbr.rel (!%p10_p4) target bundleno = 1 (0x1), region = 62 }

</bundles_post_ra>
